<compile_context>
chip_gen: v5e
topology: v5e:2x2
jax: 0.10.0
libtpu: 0.0.40
codegen_flags: <defaults>
</compile_context>

<pallas_src>
import math

import jax
import jax.numpy as jnp
from jax.experimental import pallas as pl
from jax.experimental.pallas import tpu as pltpu


def _round_up(x, m):
    return ((x + m - 1) // m) * m


# ---------------------------------------------------------------------------
# Kernels
# ---------------------------------------------------------------------------

def _linear_kernel_single_k(x_ref, w_ref, b_ref, o_ref):
    # Whole K in one tile: no accumulator scratch, no pl.when epilogue.
    acc = jnp.dot(x_ref[...], w_ref[...], preferred_element_type=jnp.float32)
    o_ref[...] = (acc + b_ref[...].astype(jnp.float32)).astype(o_ref.dtype)


def _linear_kernel_multi_k(x_ref, w_ref, b_ref, o_ref, acc_ref):
    k = pl.program_id(2)
    part = jnp.dot(x_ref[...], w_ref[...], preferred_element_type=jnp.float32)

    @pl.when(k == 0)
    def _():
        acc_ref[...] = part                      # assign: saves zero-fill + read

    @pl.when(k != 0)
    def _():
        acc_ref[...] = acc_ref[...] + part

    @pl.when(k == pl.num_programs(2) - 1)
    def _():
        o_ref[...] = (acc_ref[...] + b_ref[...].astype(jnp.float32)).astype(o_ref.dtype)


# ---------------------------------------------------------------------------
# Factory: one-time weight prep (transpose / pad / cast) kept out of hot path.
# ---------------------------------------------------------------------------

def make_generator(w, b, *, compute_dtype=jnp.bfloat16,
                   tm_max=256, tn_max=512, tk_max=2048):
    """w: (vocab, d_model) PyTorch nn.Linear layout; b: (vocab,).

    Returns forward(x) computing x @ w.T + b for x of shape (..., d_model),
    output dtype = x.dtype.
    """
    vocab, d_model = w.shape
    assert b.shape == (vocab,), b.shape

    # ---- static tile choices on the weight (K, N) axes --------------------
    tk = min(tk_max, _round_up(d_model, 128))
    Kp = _round_up(d_model, tk)
    n_k = Kp // tk

    tn = min(tn_max, _round_up(vocab, 128))
    Np = _round_up(vocab, tn)
    # Keep >= 2 output tiles along vocab so megacore (v7x, 2 TCs) always has
    # independent "parallel" work even when M is tiny (decode path).
    if Np // tn < 2 and tn > 128:
        tn = max(128, ((tn // 2) // 128) * 128)
        Np = _round_up(vocab, tn)

    # ---- one-time weight/bias prep: (vocab, d_model) -> padded (Kp, Np) ---
    w_kn = jnp.pad(w.T, ((0, Kp - d_model), (0, Np - vocab))).astype(compute_dtype)
    b_p = jnp.pad(b, (0, Np - vocab)).reshape(1, Np).astype(jnp.float32)

    c_bytes = jnp.dtype(compute_dtype).itemsize

    def forward(x):
        *lead, d = x.shape
        assert d == d_model, (d, d_model)
        out_dtype = x.dtype
        M = math.prod(lead) if lead else 1

        tm = min(tm_max, _round_up(M, 8))
        Mp = _round_up(M, tm)

        x2 = x.reshape(M, d_model).astype(compute_dtype)
        if Mp != M or Kp != d_model:
            x2 = jnp.pad(x2, ((0, Mp - M), (0, Kp - d_model)))

        o_bytes = jnp.dtype(out_dtype).itemsize
        cost = pl.CostEstimate(
            flops=2 * Mp * Np * Kp,
            transcendentals=0,
            bytes_accessed=(Mp * Kp + Kp * Np) * c_bytes + Np * 4 + Mp * Np * o_bytes,
        )
        # VMEM: double-buffered x/W/bias/out tiles (+ f32 acc when K is tiled).
        vmem_need = 2 * (tm * tk + tk * tn + tn) * c_bytes + 2 * tm * tn * o_bytes
        if n_k > 1:
            vmem_need += tm * tn * 4
        vmem_limit = int(min(max(2 * vmem_need, 32 * 1024 * 1024), 48 * 1024 * 1024))

        if n_k == 1:
            kernel = _linear_kernel_single_k
            dims = ("parallel", "parallel")
            grid_spec = pltpu.PrefetchScalarGridSpec(
                num_scalar_prefetch=0,
                grid=(Mp // tm, Np // tn),
                in_specs=[
                    pl.BlockSpec((tm, Kp), lambda i, j: (i, 0)),   # x  (M, K)
                    pl.BlockSpec((Kp, tn), lambda i, j: (0, j)),   # W  (K, N)
                    pl.BlockSpec((1, tn), lambda i, j: (0, j)),    # bias
                ],
                out_specs=pl.BlockSpec((tm, tn), lambda i, j: (i, j)),
            )
        else:
            kernel = _linear_kernel_multi_k
            dims = ("parallel", "parallel", "arbitrary")
            grid_spec = pltpu.PrefetchScalarGridSpec(
                num_scalar_prefetch=0,
                grid=(Mp // tm, Np // tn, n_k),
                in_specs=[
                    pl.BlockSpec((tm, tk), lambda i, j, k: (i, k)),   # x
                    pl.BlockSpec((tk, tn), lambda i, j, k: (k, j)),   # W (K, N)
                    pl.BlockSpec((1, tn), lambda i, j, k: (0, j)),    # bias
                ],
                out_specs=pl.BlockSpec((tm, tn), lambda i, j, k: (i, j)),
                scratch_shapes=[pltpu.VMEM((tm, tn), jnp.float32)],
            )

        out_p = pl.pallas_call(
            kernel,
            out_shape=jax.ShapeDtypeStruct((Mp, Np), out_dtype),
            grid_spec=grid_spec,
            compiler_params=pltpu.CompilerParams(
                dimension_semantics=dims,
                vmem_limit_bytes=vmem_limit,
            ),
            cost_estimate=cost,
        )(x2, w_kn, b_p)

        out = out_p
        if Mp != M or Np != vocab:
            out = out_p[:M, :vocab]
        return out.reshape(*lead, vocab) if lead else out.reshape(vocab)

    return forward


def generator_forward(x, w, b, **kwargs):
    """One-shot convenience wrapper (prep happens per call; prefer make_generator)."""
    return make_generator(w, b, **kwargs)(x)


if __name__ == "__main__":
    # Shapes implied by the forward pass: (B, S, d_model) -> (B, S, vocab).
    B, S = 2, 8
    d_model = 128
    vocab = 256

    key = jax.random.PRNGKey(0)
    k_x, k_w, k_b = jax.random.split(key, 3)

    x = jax.random.normal(k_x, (B, S, d_model), dtype=jnp.float32)
    # nn.Linear default init: U(-1/sqrt(fan_in), 1/sqrt(fan_in)).
    bound = 1.0 / math.sqrt(d_model)
    w = jax.random.uniform(k_w, (vocab, d_model), jnp.float32, -bound, bound)
    b = jax.random.uniform(k_b, (vocab,), jnp.float32, -bound, bound)

    # One-time prep (weight transpose/pad/cast), then the hot-path call.
    generator = make_generator(w, b)          # bf16 weights, f32 MXU accumulate
    out = generator(x)
    out = jax.block_until_ready(out)

    # Pure-JAX f32 reference; tolerance covers bf16 operand cast + MXU precision.
    ref = jnp.einsum("bsd,vd->bsv", x, w) + b
    assert out.shape == (B, S, vocab), out.shape
    assert out.dtype == x.dtype, out.dtype
    assert jnp.allclose(out, ref, atol=3e-2, rtol=2e-2), "mismatch vs reference"

    print("KERNEL_OK")
</pallas_src>

<mosaic_0001>
module attributes {stable_mosaic.version = 11 : i64} {
  func.func @_linear_kernel_single_k(%arg0: i32, %arg1: i32, %arg2: memref<16x128xbf16, #tpu.memory_space<vmem>>, %arg3: memref<128x128xbf16, #tpu.memory_space<vmem>>, %arg4: memref<1x128xf32, #tpu.memory_space<vmem>>, %arg5: memref<16x128xf32, #tpu.memory_space<vmem>>) attributes {dimension_semantics = [#tpu.dimension_semantics<parallel>, #tpu.dimension_semantics<parallel>], iteration_bounds = array<i64: 1, 2>, scalar_prefetch = 0 : i64, scratch_operands = 0 : i64, tpu.core_type = #tpu.core_type<tc>, window_params = [{transform_indices = @transform_0, window_bounds = array<i64: 16, 128>}, {transform_indices = @transform_1, window_bounds = array<i64: 128, 128>}, {transform_indices = @transform_2, window_bounds = array<i64: 1, 128>}, {transform_indices = @transform_3, window_bounds = array<i64: 16, 128>}]} {
    %c0 = arith.constant 0 : index
    %c0_0 = arith.constant 0 : index
    %0 = vector.load %arg2[%c0, %c0_0] : memref<16x128xbf16, #tpu.memory_space<vmem>>, vector<16x128xbf16>
    %c0_1 = arith.constant 0 : index
    %c0_2 = arith.constant 0 : index
    %1 = vector.load %arg3[%c0_1, %c0_2] : memref<128x128xbf16, #tpu.memory_space<vmem>>, vector<128x128xbf16>
    %cst = arith.constant dense<0.000000e+00> : vector<16x128xf32>
    %2 = tpu.matmul %0, %1, %cst {dimension_numbers = #tpu.dot_dimension_numbers<[1], [0], [0], [1], [0, 0, 1, 1], [], []>} : vector<16x128xbf16>, vector<128x128xbf16>, vector<16x128xf32> -> vector<16x128xf32>
    %c0_3 = arith.constant 0 : index
    %c0_4 = arith.constant 0 : index
    %3 = vector.load %arg4[%c0_3, %c0_4] : memref<1x128xf32, #tpu.memory_space<vmem>>, vector<1x128xf32>
    %4 = vector.broadcast %3 : vector<1x128xf32> to vector<16x128xf32>
    %5 = arith.addf %2, %4 : vector<16x128xf32>
    %c0_5 = arith.constant 0 : index
    %c0_6 = arith.constant 0 : index
    %6 = vector.load %arg5[%c0_5, %c0_6] : memref<16x128xf32, #tpu.memory_space<vmem>>, vector<16x128xf32>
    tpu.vector_store %arg5[%c0_5, %c0_6], %5 {strides = array<i32>} : memref<16x128xf32, #tpu.memory_space<vmem>>, vector<16x128xf32>,
    return
  }
  func.func @transform_0(%arg0: i32, %arg1: i32) -> (i32, i32) {
    %c0_i32 = arith.constant 0 : i32
    %c0_i32_0 = arith.constant 0 : i32
    return %arg0, %c0_i32 : i32, i32
  }
  func.func @transform_1(%arg0: i32, %arg1: i32) -> (i32, i32) {
    %c0_i32 = arith.constant 0 : i32
    %c0_i32_0 = arith.constant 0 : i32
    return %c0_i32, %arg1 : i32, i32
  }
  func.func @transform_2(%arg0: i32, %arg1: i32) -> (i32, i32) {
    %c0_i32 = arith.constant 0 : i32
    %c0_i32_0 = arith.constant 0 : i32
    return %c0_i32, %arg1 : i32, i32
  }
  func.func @transform_3(%arg0: i32, %arg1: i32) -> (i32, i32) {
    %c0_i32 = arith.constant 0 : i32
    return %arg0, %arg1 : i32, i32
  }
}

</mosaic_0001>

<bundles_post_ra>
// kernel: tpu_custom_call.1
= control target key start
LH: loop header
LB: loop body
LE: loop exit
PB: predicated region body
PF: predicated region fallthrough
CT: control target
= control target key end

     0   :  { %8 = vsyncpa [#allocation3], 0  ;;  %s1013_s0 = inlined_call_operand.hbm [shape: bf16[16,128], index: 0, kind: input, shape index: {}]   ;;  %s1014_s1 = inlined_call_operand.hbm [shape: bf16[128,256], index: 1, kind: input, shape index: {}]   ;;  %s1015_s2 = inlined_call_operand.hbm [shape: f32[1,256], index: 2, kind: input, shape index: {}]   ;;  %s1016_s3 = inlined_call_operand.hbm [shape: f32[16,256], index: 3, kind: output, shape index: {}]  }
   0x1   :  { %9 = vsyncpa [#allocation6], 0 }
   0x2   :  { %11 = vsyncpa [#allocation6 + $0x1], 0 }
   0x3   :  { %12 = vsyncpa [#allocation4], 0 }
   0x4   :  { %14 = vsyncpa [#allocation4 + $0x1], 0  ;;  %s836_s12 = smov 0   ;;  %s838_s13 = smov 0  }
   0x5   :  { %s840_s14 = smov 0   ;;  %s842_s15 = smov 0  }
   0x6   :  { %s844_s16 = smov 0   ;;  %s846_s17 = smov 0  }
   0x7 LB: > { %s29_s18 = sadd.s32 1, %s803_s16  ;;  %s65_s19 = sadd.s32 1, %s795_s14  ;;  %s807_s17 = sphi %s846_s17, %s20_s17   ;;  %s803_s16 = sphi %s844_s16, %s1027_s16   ;;  %s799_s15 = sphi %s842_s15, %s1026_s15   ;;  %s795_s14 = sphi %s840_s14, %s1025_s14   ;;  %s791_s13 = sphi %s838_s13, %s1024_s13   ;;  %s787_s12 = sphi %s836_s12, %s1023_s12  }
   0x8   : > { %p30_p0 = scmp.ge.s32.totalorder %s29_s18, 2  ;;  %p72_p1 = scmp.ne.s32.totalorder %s795_s14, %s791_s13 }
   0x9   : > { %p73_p2 = scmp.eq.s32.totalorder %s807_s17, 0  ;;  %p490_p4 = scmp.ge.s32.totalorder %s807_s17, 2 }
   0xa   : > { %s1029_s18 = smov (%p30_p0, %s29_s18), 0  ;;  %p572_p6 = scmp.lt.s32.totalorder %s807_s17, 2 }
   0xb   : > { %p876_p3 = por %p73_p2, %p72_p1  ;;  %s62_s21 = ssub.s32 %s803_s16, %s1029_s18 }
   0xc   : > { %p63_p5 = scmp.eq.s32.totalorder %s62_s21, 0  ;;  %s173_s22 = sand.u32 1, %s807_s17  }
   0xd   : > { %s175_s23 = sand.u32 1, %s795_s14   ;;  %s492_s26 = sshll.u32 %s803_s16, 2 }
   0xe   : > { %s887_s24 = scalar_select %p63_p5, %s795_s14, %s65_s19  }
   0xf   : > { %s491_s25 = sshll.u32 %s175_s23, 6  ;;  %s181_s29 = scalar_lea.hbm %s1014_s1, %s492_s26 }
  0x10   : > { %s177_s30 = scalar_lea.vmem [#allocation5], %s491_s25  ;;  %s182_s5 = sshll.u32 %s181_s29, 4  ;;  %s183_s5 = int_to_ptr.hbm [resolvable:$true] %s182_s5 }
  0x11   : > { %s184_s4 = sshll.u32 %s177_s30, 4  ;;  %p897_p7 = pnand %p572_p6, %p876_p3  ;;  %s185_s4 = int_to_ptr.vmem [resolvable:$true] %s184_s4 }
  0x12   : > { %s901_s7 = scalar_lea.sflag [#allocation6], %s173_s22  ;;  %s809_s8 = smov 128  }
  0x13   : > { %s810_s9 = smov 64   ;;  %s811_s10 = smov 4  }
  0x14   : > { %563 = dma.hbm_to_vmem [thread:$0]  (!%p897_p7), %s183_s5, 1024, %s185_s4, %s901_s7, %s809_s8, %s810_s9, %s811_s10  }
  0x15   : > { %s909_s11 = sadd.s32 4294967295, %s807_s17   ;;  %s487_s19 = sadd.s32 4294967294, %s807_s17  }
  0x16   : > { %p78_p8 = scmp.ne.s32.totalorder %s791_s13, %s787_s12  ;;  %p79_p9 = scmp.eq.s32.totalorder %s909_s11, 0 }
  0x17   : > { %p130_p10 = scmp.eq.s32.totalorder %s909_s11, 1  ;;  %p136_p11 = scmp.eq.s32.totalorder %s487_s19, 1 }
  0x18   : > { %p918_p12 = por %p79_p9, %p78_p8  ;;  %p488_p13 = scmp.ge.s32.totalorder %s807_s17, 1 }
  0x19   : > { %p926_p0 = por %p130_p10, %p72_p1  ;;  %p930_p2 = por %p136_p11, %p78_p8 }
  0x1a   : > { %p143_p3 = scmp.lt.s32.totalorder %s807_s17, 3  ;;  %s157_s27 = sshll.u32 %s1013_s0, 4  ;;  %s158_s27 = int_to_ptr.hbm [resolvable:$true] %s157_s27 }
  0x1b   : > { %s812_s29 = smov [#allocation2]   ;;  %s200_s8 = scalar_lea.hbm %s1015_s2, %s803_s16 }
  0x1c   : > { %p938_p5 = pnand %p488_p13, %p143_p3  ;;  %s159_s30 = sshll.u32 %s812_s29, 4  ;;  %s160_s30 = int_to_ptr.vmem [resolvable:$true] %s159_s30 }
  0x1d   : > { %s197_s19 = scalar_lea.vmem [#allocation7], %s175_s23  ;;  %s202_s26 = sshll.u32 %s200_s8, 4  ;;  %s203_s26 = int_to_ptr.hbm [resolvable:$true] %s202_s26 }
  0x1e   : > { %p556_p1 = pneg %p938_p5  ;;  %s204_s25 = sshll.u32 %s197_s19, 4  ;;  %s205_s25 = int_to_ptr.vmem [resolvable:$true] %s204_s25 }
  0x1f   : > { %566 = dma.hbm_to_vmem [thread:$0]  (!%p897_p7), %s203_s26, 16, %s205_s25, %s901_s7  }
  0x20   : > { %p557_p6 = pnand %p556_p1, %p79_p9  ;;  %213 = sbr.rel (%p938_p5) target bundleno = 215 (0xd7), region = 32 }
  0x22   : > { %559 = dma.hbm_to_vmem [thread:$0]  (!%p557_p6), %s158_s27, 128, %s160_s30, [#allocation3], %s810_s9, %s810_s9, %s811_s10  }
  0x25   : > { %774 = dma.done.wait (%p79_p9), [#allocation3], 128  }
  0x26   : > { %776 = vsyncadd (%p79_p9), [#allocation3], 4294967168  ;;  %s220_s23 = sand.u32 1, %s909_s11   ;;  %s966_s29 = sand.u32 1, %s791_s13  }
  0x27   : > { %s495_s4 = sshll.u32 %s966_s29, 6  ;;  %s221_s9 = scalar_lea.sflag [#allocation6], %s220_s23 }
  0x28   : > { %s224_s6 = scalar_lea.vmem [#allocation5], %s495_s4 }
  0x29   : > { %778 = dma.done.wait (%p918_p12), %s221_s9, 1040  }
  0x2a   : > { %780 = vsyncadd (%p918_p12), %s221_s9, 4294966256  ;;  %v545_v0 = vld [vmem:[%s224_s6 + $0x38] sm:$0xff]  ;;  %v544_v1 = vld [vmem:[%s224_s6 + $0x30] sm:$0xff]  ;;  %s233_s7 = scalar_lea.vmem [#allocation7], %s966_s29  ;;  %s496_s10 = sshll.u32 %s966_s29, 4 }
  0x2b   : > { %339 = vmatpush.bf16.msra.mxu0 %v545_v0  ;;  %v543_v2 = vld [vmem:[%s224_s6 + $0x28] sm:$0xff]  ;;  %v542_v3 = vld [vmem:[%s224_s6 + $0x20] sm:$0xff]  ;;  %v541_v4 = vld [vmem:[%s224_s6 + $0x18] sm:$0xff]  ;;  %s534_s11 = sshll.u32 %s799_s15, 3  ;;  %s260_s30 = scalar_lea.vmem [#allocation8], %s496_s10 }
  0x2c   : > { %v540_v5 = vld [vmem:[%s224_s6 + $0x10] sm:$0xff]  ;;  %v539_v6 = vld [vmem:[%s224_s6 + $0x8] sm:$0xff]  ;;  %v538_v7 = vld [vmem:[%s224_s6] sm:$0xff]  ;;  %s369_s28 = scalar_lea.hbm %s1016_s3, %s534_s11  ;;  %s370_s5 = sshll.u32 %s260_s30, 4  ;;  %s371_s5 = int_to_ptr.vmem [resolvable:$true] %s370_s5 }
  0x2d   : > { %v537_v8 = vld [vmem:[#allocation2] sm:$0xff]  ;;  %s372_s8 = sshll.u32 %s369_s28, 4  ;;  %s356_s19 = scalar_lea.sflag [#allocation4], %s966_s29  ;;  %s373_s8 = int_to_ptr.hbm [resolvable:$true] %s372_s8 }
  0x2e   : > { %v630_v9 = vld [vmem:[%s233_s7] ss:$0 sm:$0xff]  ;;  %s735_s25 = sshra.s32 %s373_s8, 4  ;;  %s741_s4 = scalar_lea.hbm %s1016_s3, 32  ;;  %s736_s25 = int_to_ptr.hbm [resolvable:$true] %s735_s25 }
  0x2f   : > { %340 = vmatpush.bf16.msra.mxu0 %v544_v1  ;;  %s737_s15 = scalar_lea.hbm %s736_s25, 16  ;;  %p742_p10 = scmp.lt.s32.totalorder %s736_s25, %s1016_s3 }
  0x30   : > { %p738_p7 = scmp.ne.s32.totalorder %s736_s25, %s737_s15  ;;  %p743_p11 = scmp.lt.s32.totalorder %s741_s4, %s737_s15 }
  0x32   : > { %p739_p8 = pnand %p738_p7, %p926_p0  ;;  %p744_p12 = por %p743_p11, %p742_p10 }
  0x33   : > { %341 = vmatpush.bf16.msra.mxu0 %v543_v2 }
  0x34   : > { %p740_p9 = pneg %p739_p8 }
  0x36   : > { %p745_p13 = pnand %p744_p12, %p740_p9 }
  0x37   : > { %342 = vmatpush.bf16.msra.mxu0 %v542_v3 }
  0x3b   : > { %343 = vmatpush.bf16.msra.mxu0 %v541_v4 }
  0x3f   : > { %344 = vmatpush.bf16.msra.mxu0 %v540_v5 }
  0x43   : > { %345 = vmatpush.bf16.msra.mxu0 %v539_v6 }
  0x47   : > { %346 = vmatpush.bf16.msra.mxu0 %v538_v7 }
  0x4a   : > { %347 = vmatmul.bf16.vlgmr.msra.gmra.mxu0 %v537_v8 }
  0xc7   : > { %v348_v10 = vpop.f32.mrf.mxu0 }
  0xc8   : > { %v349_v11 = vadd.f32 %v630_v9, %v348_v10 }
  0xca   : > { %353 = vst [vmem:[%s260_s30] sm:$0xff] %v349_v11 }
  0xcf   : > { %v350_v12 = vpop.f32.mrf.mxu0 }
  0xd0   : > { %v351_v13 = vadd.f32 %v630_v9, %v350_v12 }
  0xd2   : > { %354 = vst [vmem:[%s260_s30 + $0x8] sm:$0xff] %v351_v13 }
  0xd3   : > { %748 = shalt.err (!%p745_p13)
}
  0xd4   : > { %s813_s29 = smov 128   ;;  %s814_s7 = smov 256  }
  0xd5   : > { %s815_s10 = smov 8  }
  0xd6   : > { %554 = dma.vmem_to_hbm [thread:$0]  (%p926_p0), %s371_s5, 256, %s373_s8, %s356_s19, %s813_s29, %s814_s7, %s815_s10  }
  0xd7 PF: > { %s387_s11 = sand.u32 1, %s787_s12   ;;  %p568_p3 = pnand %p490_p4, %p930_p2 }
  0xd8   : > { %s388_s20 = scalar_lea.sflag [#allocation4], %s387_s11 }
  0xd9   : > { %p569_p5 = pneg %p568_p3 }
  0xdb   : > { %782 = dma.done.wait (%p569_p5), %s388_s20, 256  }
  0xdc   : > { %784 = vsyncadd (%p569_p5), %s388_s20, 4294967040  ;;  %s20_s17 = sadd.s32 1, %s807_s17   ;;  %s1023_s12 = smov %s791_s13 }
  0xdd   : > { %p17_p1 = scmp.ge.s32.totalorder %s20_s17, 4   ;;  %s1024_s13 = smov %s795_s14 }
  0xde   : > { %s1025_s14 = smov %s887_s24  ;;  %s1026_s15 = smov %s803_s16 }
  0xdf   : > { %s1027_s16 = smov %s1029_s18  ;;  %19 = sbr.rel (!%p17_p1) target bundleno = 7 (0x7), region = 94 }
  0xe4   :  { %394 = vsyncpa [#allocation3], 1 }
  0xe5   :  { %396 = vsyncpa [#allocation3 + $0x1], 1 }
  0xe6   :  { %397 = vsyncpa [#allocation6], 1 }
  0xe7   :  { %399 = vsyncpa [#allocation6 + $0x1], 1 }
  0xe8   :  { %400 = vsyncpa [#allocation4], 1 }
  0xe9   :  { %402 = vsyncpa [#allocation4 + $0x1], 1 }

</bundles_post_ra>
